<compile_context>
chip_gen: v7x
topology: tpu7x:2x2x1
jax: 0.10.0
libtpu: 0.0.40
codegen_flags: <defaults>
</compile_context>

<pallas_src>
import functools

import jax
import jax.numpy as jnp
from jax.experimental import pallas as pl
from jax.experimental.pallas import tpu as pltpu

LANES = 128
MAX_BLOCK_ROWS = 8192      # 8192*128*4B = 4 MiB f32 per input per buffer
SMOOTH = 1e-6
BCE_WEIGHT = 0.5
DICE_WEIGHT = 0.5


def _round_up(x, m):
    return ((x + m - 1) // m) * m


@functools.lru_cache(maxsize=1)
def _num_tensorcores():
    """2 on v7x (2 TensorCores/chip), 1 on v5e/v6e/unknown."""
    try:
        dev = jax.devices()[0]
        if dev.platform != "tpu":
            return 1
        kind = (getattr(dev, "device_kind", "") or "").lower().replace(" ", "")
        if "v7" in kind or "tpu7" in kind:
            return 2
    except Exception:
        pass
    return 1


def _combined_loss_kernel(p_ref, t_ref, out_ref, *, rows, num_blocks,
                          mask_tail, binary_targets):
    """Accumulate per-partition (sum(-bce), sum(p*t), sum(p), sum(t)) vregs."""
    part = pl.program_id(0)
    step = pl.program_id(1)
    block_rows = p_ref.shape[0]

    @pl.when(step == 0)
    def _():
        out_ref[...] = jnp.zeros_like(out_ref)

    def accumulate(p, t):
        if binary_targets:
            # One EUP log per element; valid only for t in {0, 1}.
            q = jnp.where(t > 0.5, p, 1.0 - p)
            neg_bce = jnp.maximum(jnp.log(q), -100.0)
        else:
            # Clamp BEFORE the multiply so t=0 / p=0 (incl. masked rows) give
            # exactly 0 contribution rather than 0 * (-inf).
            log_p = jnp.maximum(jnp.log(p), -100.0)
            log_1mp = jnp.maximum(jnp.log(1.0 - p), -100.0)
            neg_bce = t * (log_p - log_1mp) + log_1mp

        def vsum(x):
            # (block_rows, 128) -> (8, 128): tile-aligned leading-dim split,
            # pure VPU vreg adds, no cross-lane (XLU) reduction in the loop.
            return jnp.sum(x.reshape(-1, 8, LANES), axis=0)

        out_ref[0, 0] += vsum(neg_bce)
        out_ref[0, 1] += vsum(p * t)
        out_ref[0, 2] += vsum(p)
        out_ref[0, 3] += vsum(t)

    if not mask_tail:
        # All blocks are full and every (part, step) maps to a distinct block:
        # no masking anywhere.
        accumulate(p_ref[...].astype(jnp.float32),
                   t_ref[...].astype(jnp.float32))
    else:
        blk = part * pl.num_programs(1) + step
        last = num_blocks - 1

        @pl.when(blk < last)
        def _():
            # Interior blocks: unmasked fast path.
            accumulate(p_ref[...].astype(jnp.float32),
                       t_ref[...].astype(jnp.float32))

        @pl.when(blk >= last)
        def _():
            # Tail block (possibly partial) and any clamped duplicate block of
            # the last partition: rows past the real data are masked to
            # (p=0, t=0), which contributes exactly 0 to every sum.
            row0 = blk * block_rows
            row_ids = row0 + jax.lax.broadcasted_iota(
                jnp.int32, (block_rows, LANES), 0)
            m = row_ids < rows
            accumulate(jnp.where(m, p_ref[...].astype(jnp.float32), 0.0),
                       jnp.where(m, t_ref[...].astype(jnp.float32), 0.0))


def combined_loss(predictions, targets, *, assume_binary_targets=False):
    """Pallas TPU implementation of CombinedLoss.forward (BCE + Dice)."""
    assert predictions.shape == targets.shape
    total_n = predictions.size

    flat_p = predictions.reshape(-1)   # contiguous reshape: no copy
    flat_t = targets.reshape(-1)

    rem = total_n % LANES
    n_main = total_n - rem

    # The (<128-element) remainder is folded in via a tiny JAX epilogue so the
    # kernel only ever sees a lane-aligned slab (no full-tensor jnp.pad).
    if rem:
        tail_p = flat_p[n_main:].astype(jnp.float32)
        tail_t = flat_t[n_main:].astype(jnp.float32)
        tlp = jnp.maximum(jnp.log(tail_p), -100.0)
        tl1 = jnp.maximum(jnp.log(1.0 - tail_p), -100.0)
        tail_neg_bce = jnp.sum(tail_t * tlp + (1.0 - tail_t) * tl1)
        tail_pt = jnp.sum(tail_p * tail_t)
        tail_sp = jnp.sum(tail_p)
        tail_st = jnp.sum(tail_t)
    else:
        zero = jnp.float32(0.0)
        tail_neg_bce = tail_pt = tail_sp = tail_st = zero

    if n_main == 0:
        # Fewer than 128 elements total: pure JAX, no kernel launch.
        sums = jnp.stack([tail_neg_bce, tail_pt, tail_sp, tail_st])
    else:
        if rem:
            # Rare misaligned path: this prefix slice may materialize a copy.
            # TODO(synk): a flat 1D BlockSpec + in-kernel reshape would avoid
            # even this copy; kept 2D for proven-clean lowering.
            p_main = flat_p[:n_main]
            t_main = flat_t[:n_main]
        else:
            p_main, t_main = flat_p, flat_t

        rows = n_main // LANES
        p2 = p_main.reshape(rows, LANES)
        t2 = t_main.reshape(rows, LANES)

        block_rows = min(MAX_BLOCK_ROWS, _round_up(rows, 8))
        num_blocks = pl.cdiv(rows, block_rows)
        num_parts = min(_num_tensorcores(), num_blocks)
        steps = pl.cdiv(num_blocks, num_parts)
        # Masking is only needed if the last block is partial or the last
        # partition re-reads a clamped duplicate block.
        mask_tail = (rows % block_rows != 0) or (num_parts * steps != num_blocks)

        def in_map(part, step):
            # Clamp so trailing iterations of the last partition re-read a
            # valid block; the in-kernel row mask zeroes their contribution.
            return (jnp.minimum(part * steps + step, num_blocks - 1), 0)

        kernel = functools.partial(
            _combined_loss_kernel, rows=rows, num_blocks=num_blocks,
            mask_tail=mask_tail, binary_targets=assume_binary_targets)

        cost = pl.CostEstimate(
            flops=10 * n_main,
            transcendentals=(1 if assume_binary_targets else 2) * n_main,
            bytes_accessed=n_main * (p2.dtype.itemsize + t2.dtype.itemsize),
        )

        partials = pl.pallas_call(
            kernel,
            out_shape=jax.ShapeDtypeStruct((num_parts, 4, 8, LANES),
                                           jnp.float32),
            grid_spec=pltpu.PrefetchScalarGridSpec(
                num_scalar_prefetch=0,
                grid=(num_parts, steps),
                in_specs=[
                    pl.BlockSpec((block_rows, LANES), in_map),
                    pl.BlockSpec((block_rows, LANES), in_map),
                ],
                out_specs=pl.BlockSpec(
                    (1, 4, 8, LANES), lambda part, step: (part, 0, 0, 0)
                ),
            ),
            compiler_params=pltpu.CompilerParams(
                dimension_semantics=("parallel", "arbitrary"),
                vmem_limit_bytes=32 * 1024 * 1024,
            ),
            cost_estimate=cost,
        )(p2, t2)

        ks = jnp.sum(partials, axis=(0, 2, 3))            # (4,)
        sums = ks + jnp.stack([tail_neg_bce, tail_pt, tail_sp, tail_st])

    # Scalar epilogue: single negation of the BCE sum + Dice math.
    bce_loss = -sums[0] / jnp.float32(total_n)
    dice = (2.0 * sums[1] + SMOOTH) / (sums[2] + sums[3] + SMOOTH)
    dice_loss = 1.0 - dice
    return BCE_WEIGHT * bce_loss + DICE_WEIGHT * dice_loss


def _reference_combined_loss(predictions, targets):
    p = predictions.reshape(-1).astype(jnp.float32)
    t = targets.reshape(-1).astype(jnp.float32)
    log_p = jnp.maximum(jnp.log(p), -100.0)
    log_1mp = jnp.maximum(jnp.log(1.0 - p), -100.0)
    bce = jnp.mean(-(t * log_p + (1.0 - t) * log_1mp))
    inter = jnp.sum(p * t)
    dice = (2.0 * inter + SMOOTH) / (jnp.sum(p) + jnp.sum(t) + SMOOTH)
    return BCE_WEIGHT * bce + DICE_WEIGHT * (1.0 - dice)


if __name__ == "__main__":
    key = jax.random.PRNGKey(0)

    # Shapes exercise: single block / single partition; single large block;
    # multiple blocks + partial tail (+ clamped duplicate block on 2-TC chips);
    # a lane-misaligned remainder (epilogue path); and a <128-element input
    # (pure-JAX fallback).
    shapes = [
        (2, 4, 16, 16),       # rows=16, one block, no masking
        (2, 4, 320, 240),     # rows=4800, one big block
        (2, 4, 512, 520),     # rows=16640 -> 3 blocks of 8192, partial tail
        (3, 343),             # 1029 elems -> rem=5, epilogue remainder path
        (2, 50),              # 100 elems -> pure-JAX fallback
    ]
    for shape in shapes:
        key, kp, kt = jax.random.split(key, 3)
        predictions = jax.random.uniform(kp, shape, jnp.float32, 0.01, 0.99)
        targets = (jax.random.uniform(kt, shape, jnp.float32) > 0.5).astype(
            jnp.float32
        )

        loss = combined_loss(predictions, targets)
        jax.block_until_ready(loss)

        ref = _reference_combined_loss(predictions, targets)
        assert jnp.allclose(loss, ref, rtol=2e-4, atol=2e-5), (shape, loss, ref)

    # Opt-in binary-targets fast path (one log/element); targets above are
    # binary so the same reference applies exactly.
    key, kp, kt = jax.random.split(key, 3)
    predictions = jax.random.uniform(kp, (2, 4, 16, 16), jnp.float32, 0.01, 0.99)
    targets = (jax.random.uniform(kt, (2, 4, 16, 16), jnp.float32) > 0.5).astype(
        jnp.float32
    )
    loss = combined_loss(predictions, targets, assume_binary_targets=True)
    jax.block_until_ready(loss)
    ref = _reference_combined_loss(predictions, targets)
    assert jnp.allclose(loss, ref, rtol=2e-4, atol=2e-5), (loss, ref)

    print("KERNEL_OK")
</pallas_src>

<mosaic_0001>
module attributes {stable_mosaic.version = 11 : i64} {
  func.func @_combined_loss_kernel(%arg0: i32, %arg1: i32, %arg2: memref<16x128xf32, #tpu.memory_space<vmem>>, %arg3: memref<16x128xf32, #tpu.memory_space<vmem>>, %arg4: memref<1x4x8x128xf32, #tpu.memory_space<vmem>>) attributes {dimension_semantics = [#tpu.dimension_semantics<parallel>, #tpu.dimension_semantics<arbitrary>], iteration_bounds = array<i64: 1, 1>, scalar_prefetch = 0 : i64, scratch_operands = 0 : i64, tpu.core_type = #tpu.core_type<tc>, window_params = [{transform_indices = @transform_0, window_bounds = array<i64: 16, 128>}, {transform_indices = @transform_1, window_bounds = array<i64: 16, 128>}, {transform_indices = @transform_2, window_bounds = array<i64: 1, 4, 8, 128>}]} {
    %c0_i32 = arith.constant 0 : i32
    %0 = arith.cmpi eq, %arg1, %c0_i32 : i32
    %1 = arith.extui %0 : i1 to i32
    %c0_i32_0 = arith.constant 0 : i32
    %2 = arith.cmpi ne, %1, %c0_i32_0 : i32
    scf.if %2 {
      %cst_39 = arith.constant 0.000000e+00 : f32
      %49 = vector.broadcast %cst_39 : f32 to vector<1x4x8x128xf32>
      %c0_40 = arith.constant 0 : index
      %c0_41 = arith.constant 0 : index
      %c0_42 = arith.constant 0 : index
      %c0_43 = arith.constant 0 : index
      %50 = vector.load %arg4[%c0_40, %c0_41, %c0_42, %c0_43] : memref<1x4x8x128xf32, #tpu.memory_space<vmem>>, vector<1x4x8x128xf32>
      tpu.vector_store %arg4[%c0_40, %c0_41, %c0_42, %c0_43], %49 {strides = array<i32>} : memref<1x4x8x128xf32, #tpu.memory_space<vmem>>, vector<1x4x8x128xf32>,
    } else {
    }
    %c0 = arith.constant 0 : index
    %c0_1 = arith.constant 0 : index
    %3 = vector.load %arg2[%c0, %c0_1] : memref<16x128xf32, #tpu.memory_space<vmem>>, vector<16x128xf32>
    %c0_2 = arith.constant 0 : index
    %c0_3 = arith.constant 0 : index
    %4 = vector.load %arg3[%c0_2, %c0_3] : memref<16x128xf32, #tpu.memory_space<vmem>>, vector<16x128xf32>
    %5 = math.log %3 : vector<16x128xf32>
    %cst = arith.constant -1.000000e+02 : f32
    %6 = vector.broadcast %cst : f32 to vector<16x128xf32>
    %7 = arith.maximumf %5, %6 : vector<16x128xf32>
    %cst_4 = arith.constant 1.000000e+00 : f32
    %8 = vector.broadcast %cst_4 : f32 to vector<16x128xf32>
    %9 = arith.subf %8, %3 : vector<16x128xf32>
    %10 = math.log %9 : vector<16x128xf32>
    %cst_5 = arith.constant -1.000000e+02 : f32
    %11 = vector.broadcast %cst_5 : f32 to vector<16x128xf32>
    %12 = arith.maximumf %10, %11 : vector<16x128xf32>
    %13 = arith.subf %7, %12 : vector<16x128xf32>
    %14 = arith.mulf %4, %13 : vector<16x128xf32>
    %15 = arith.addf %14, %12 : vector<16x128xf32>
    %c0_6 = arith.constant 0 : index
    %c0_7 = arith.constant 0 : index
    %c0_8 = arith.constant 0 : index
    %c0_9 = arith.constant 0 : index
    %16 = vector.load %arg4[%c0_6, %c0_7, %c0_8, %c0_9] : memref<1x4x8x128xf32, #tpu.memory_space<vmem>>, vector<1x1x8x128xf32>
    %17 = vector.shape_cast %16 : vector<1x1x8x128xf32> to vector<8x128xf32>
    %18 = vector.shape_cast %15 : vector<16x128xf32> to vector<2x8x128xf32>
    %cst_10 = arith.constant dense<0.000000e+00> : vector<8x128xf32>
    %19 = vector.multi_reduction <add>, %18, %cst_10 [0] : vector<2x8x128xf32> to vector<8x128xf32>
    %20 = arith.addf %17, %19 : vector<8x128xf32>
    %c0_11 = arith.constant 0 : index
    %c0_12 = arith.constant 0 : index
    %c0_13 = arith.constant 0 : index
    %c0_14 = arith.constant 0 : index
    %21 = vector.load %arg4[%c0_11, %c0_12, %c0_13, %c0_14] : memref<1x4x8x128xf32, #tpu.memory_space<vmem>>, vector<1x1x8x128xf32>
    %22 = vector.shape_cast %21 : vector<1x1x8x128xf32> to vector<8x128xf32>
    %23 = vector.shape_cast %20 : vector<8x128xf32> to vector<1x1x8x128xf32>
    tpu.vector_store %arg4[%c0_11, %c0_12, %c0_13, %c0_14], %23 {strides = array<i32>} : memref<1x4x8x128xf32, #tpu.memory_space<vmem>>, vector<1x1x8x128xf32>,
    %c0_15 = arith.constant 0 : index
    %c1 = arith.constant 1 : index
    %c0_16 = arith.constant 0 : index
    %c0_17 = arith.constant 0 : index
    %24 = vector.load %arg4[%c0_15, %c1, %c0_16, %c0_17] : memref<1x4x8x128xf32, #tpu.memory_space<vmem>>, vector<1x1x8x128xf32>
    %25 = vector.shape_cast %24 : vector<1x1x8x128xf32> to vector<8x128xf32>
    %26 = arith.mulf %3, %4 : vector<16x128xf32>
    %27 = vector.shape_cast %26 : vector<16x128xf32> to vector<2x8x128xf32>
    %cst_18 = arith.constant dense<0.000000e+00> : vector<8x128xf32>
    %28 = vector.multi_reduction <add>, %27, %cst_18 [0] : vector<2x8x128xf32> to vector<8x128xf32>
    %29 = arith.addf %25, %28 : vector<8x128xf32>
    %c0_19 = arith.constant 0 : index
    %c1_20 = arith.constant 1 : index
    %c0_21 = arith.constant 0 : index
    %c0_22 = arith.constant 0 : index
    %30 = vector.load %arg4[%c0_19, %c1_20, %c0_21, %c0_22] : memref<1x4x8x128xf32, #tpu.memory_space<vmem>>, vector<1x1x8x128xf32>
    %31 = vector.shape_cast %30 : vector<1x1x8x128xf32> to vector<8x128xf32>
    %32 = vector.shape_cast %29 : vector<8x128xf32> to vector<1x1x8x128xf32>
    tpu.vector_store %arg4[%c0_19, %c1_20, %c0_21, %c0_22], %32 {strides = array<i32>} : memref<1x4x8x128xf32, #tpu.memory_space<vmem>>, vector<1x1x8x128xf32>,
    %c0_23 = arith.constant 0 : index
    %c2 = arith.constant 2 : index
    %c0_24 = arith.constant 0 : index
    %c0_25 = arith.constant 0 : index
    %33 = vector.load %arg4[%c0_23, %c2, %c0_24, %c0_25] : memref<1x4x8x128xf32, #tpu.memory_space<vmem>>, vector<1x1x8x128xf32>
    %34 = vector.shape_cast %33 : vector<1x1x8x128xf32> to vector<8x128xf32>
    %35 = vector.shape_cast %3 : vector<16x128xf32> to vector<2x8x128xf32>
    %cst_26 = arith.constant dense<0.000000e+00> : vector<8x128xf32>
    %36 = vector.multi_reduction <add>, %35, %cst_26 [0] : vector<2x8x128xf32> to vector<8x128xf32>
    %37 = arith.addf %34, %36 : vector<8x128xf32>
    %c0_27 = arith.constant 0 : index
    %c2_28 = arith.constant 2 : index
    %c0_29 = arith.constant 0 : index
    %c0_30 = arith.constant 0 : index
    %38 = vector.load %arg4[%c0_27, %c2_28, %c0_29, %c0_30] : memref<1x4x8x128xf32, #tpu.memory_space<vmem>>, vector<1x1x8x128xf32>
    %39 = vector.shape_cast %38 : vector<1x1x8x128xf32> to vector<8x128xf32>
    %40 = vector.shape_cast %37 : vector<8x128xf32> to vector<1x1x8x128xf32>
    tpu.vector_store %arg4[%c0_27, %c2_28, %c0_29, %c0_30], %40 {strides = array<i32>} : memref<1x4x8x128xf32, #tpu.memory_space<vmem>>, vector<1x1x8x128xf32>,
    %c0_31 = arith.constant 0 : index
    %c3 = arith.constant 3 : index
    %c0_32 = arith.constant 0 : index
    %c0_33 = arith.constant 0 : index
    %41 = vector.load %arg4[%c0_31, %c3, %c0_32, %c0_33] : memref<1x4x8x128xf32, #tpu.memory_space<vmem>>, vector<1x1x8x128xf32>
    %42 = vector.shape_cast %41 : vector<1x1x8x128xf32> to vector<8x128xf32>
    %43 = vector.shape_cast %4 : vector<16x128xf32> to vector<2x8x128xf32>
    %cst_34 = arith.constant dense<0.000000e+00> : vector<8x128xf32>
    %44 = vector.multi_reduction <add>, %43, %cst_34 [0] : vector<2x8x128xf32> to vector<8x128xf32>
    %45 = arith.addf %42, %44 : vector<8x128xf32>
    %c0_35 = arith.constant 0 : index
    %c3_36 = arith.constant 3 : index
    %c0_37 = arith.constant 0 : index
    %c0_38 = arith.constant 0 : index
    %46 = vector.load %arg4[%c0_35, %c3_36, %c0_37, %c0_38] : memref<1x4x8x128xf32, #tpu.memory_space<vmem>>, vector<1x1x8x128xf32>
    %47 = vector.shape_cast %46 : vector<1x1x8x128xf32> to vector<8x128xf32>
    %48 = vector.shape_cast %45 : vector<8x128xf32> to vector<1x1x8x128xf32>
    tpu.vector_store %arg4[%c0_35, %c3_36, %c0_37, %c0_38], %48 {strides = array<i32>} : memref<1x4x8x128xf32, #tpu.memory_space<vmem>>, vector<1x1x8x128xf32>,
    return
  }
  func.func @transform_0(%arg0: i32, %arg1: i32) -> (i32, i32) {
    %c1_i32 = arith.constant 1 : i32
    %0 = arith.muli %arg0, %c1_i32 : i32
    %1 = arith.addi %0, %arg1 : i32
    %c0_i32 = arith.constant 0 : i32
    %2 = arith.minsi %1, %c0_i32 : i32
    %c0_i32_0 = arith.constant 0 : i32
    %c0_i32_1 = arith.constant 0 : i32
    return %2, %c0_i32_0 : i32, i32
  }
  func.func @transform_1(%arg0: i32, %arg1: i32) -> (i32, i32) {
    %c1_i32 = arith.constant 1 : i32
    %0 = arith.muli %arg0, %c1_i32 : i32
    %1 = arith.addi %0, %arg1 : i32
    %c0_i32 = arith.constant 0 : i32
    %2 = arith.minsi %1, %c0_i32 : i32
    %c0_i32_0 = arith.constant 0 : i32
    %c0_i32_1 = arith.constant 0 : i32
    return %2, %c0_i32_0 : i32, i32
  }
  func.func @transform_2(%arg0: i32, %arg1: i32) -> (i32, i32, i32, i32) {
    %c0_i32 = arith.constant 0 : i32
    %c0_i32_0 = arith.constant 0 : i32
    %c0_i32_1 = arith.constant 0 : i32
    %c0_i32_2 = arith.constant 0 : i32
    return %arg0, %c0_i32, %c0_i32_0, %c0_i32_1 : i32, i32, i32, i32
  }
}

</mosaic_0001>

<bundles_post_ra>
// kernel: tpu_custom_call.1
= control target key start
LH: loop header
LB: loop body
LE: loop exit
PB: predicated region body
PF: predicated region fallthrough
CT: control target
= control target key end

     0   :  { %7 = vsyncpa [#allocation3], 0  ;;  %s286_s0 = inlined_call_operand.hbm [shape: f32[16,128], index: 0, kind: input, shape index: {}]   ;;  %s287_s1 = inlined_call_operand.hbm [shape: f32[16,128], index: 1, kind: input, shape index: {}]   ;;  %s288_s2 = inlined_call_operand.hbm [shape: f32[1,4,8,128], index: 2, kind: output, shape index: {}]  }
   0x1   :  { %8 = vsyncpa [#allocation6], 0 }
   0x2   :  { %9 = vsyncpa [#allocation4], 0  ;;  %s221_s9 = smov [#allocation2]   ;;  %s149_s13 = scalar_lea.hbm %s286_s0, 256 }
   0x3   :  { %s21_s10 = sshll.u32 %s221_s9, 4  ;;  %p150_p0 = scmp.ne.s32.totalorder %s286_s0, %s149_s13  ;;  %s22_s10 = int_to_ptr.vmem [resolvable:$true] %s21_s10 }
   0x4   :  { %p153_p1 = scmp.lt.u32.totalorder %s149_s13, %s286_s0 }
   0x6   :  { %p155_p2 = pnand %p153_p1, %p150_p0 }
   0x8   :  { %158 = shalt.err (!%p155_p2)
}
   0x9   :  { %s159_s18 = scalar_lea.vmem %s22_s10, 256  ;;  %p164_p4 = scmp.lt.s32.totalorder %s22_s10, %s22_s10 }
   0xa   :  { %p160_p3 = scmp.ne.s32.totalorder %s22_s10, %s159_s18  ;;  %p165_p5 = scmp.lt.s32.totalorder %s159_s18, %s159_s18 }
   0xc   :  { %p166_p6 = por %p165_p5, %p164_p4 }
   0xe   :  { %p167_p7 = pnand %p166_p6, %p160_p3 }
  0x10   :  { %170 = shalt.err (!%p167_p7)
}
  0x11   :  { %s222_s19 = smov 128   ;;  %s223_s20 = smov 8  }
  0x12   :  { %27 = dma.hbm_to_vmem [thread:$0]  %s286_s0, 256, %s22_s10, [#allocation3], %s222_s19, %s222_s19, %s223_s20  }
  0x13   :  { %s224_s23 = smov [#allocation5]   ;;  %s171_s27 = scalar_lea.hbm %s287_s1, 256 }
  0x14   :  { %s39_s24 = sshll.u32 %s224_s23, 4  ;;  %p172_p8 = scmp.ne.s32.totalorder %s287_s1, %s171_s27  ;;  %s40_s24 = int_to_ptr.vmem [resolvable:$true] %s39_s24 }
  0x15   :  { %p175_p9 = scmp.lt.u32.totalorder %s171_s27, %s287_s1 }
  0x17   :  { %p177_p10 = pnand %p175_p9, %p172_p8 }
  0x19   :  { %180 = shalt.err (!%p177_p10)
}
  0x1a   :  { %s181_s4 = scalar_lea.vmem %s40_s24, 256  ;;  %p186_p12 = scmp.lt.s32.totalorder %s40_s24, %s40_s24 }
  0x1b   :  { %p182_p11 = scmp.ne.s32.totalorder %s40_s24, %s181_s4  ;;  %p187_p13 = scmp.lt.s32.totalorder %s181_s4, %s181_s4 }
  0x1d   :  { %p188_p0 = por %p187_p13, %p186_p12 }
  0x1f   :  { %p189_p1 = pnand %p188_p0, %p182_p11 }
  0x21   :  { %192 = shalt.err (!%p189_p1)
}
  0x22   :  { %45 = dma.hbm_to_vmem [thread:$0]  %s287_s1, 256, %s40_s24, [#allocation6], %s222_s19, %s222_s19, %s223_s20  }
  0x23   :  { %215 = dma.done.wait [#allocation3], 256  }
  0x24   :  { %216 = vsyncadd [#allocation3], 4294967040 }
  0x25   :  { %217 = dma.done.wait [#allocation6], 256  }
  0x26   :  { %218 = vsyncadd [#allocation6], 4294967040  ;;  %v68_v0 = vld [vmem:[#allocation2] sm:$0xff]  ;;  %v69_v1 = vld [vmem:[#allocation2 + $0x8] sm:$0xff]  ;;  %s225_s1 = smov [#allocation7]  }
  0x27   :  { %v70_v2 = vld [vmem:[#allocation5] sm:$0xff]  ;;  %v71_v3 = vld [vmem:[#allocation5 + $0x8] sm:$0xff]  ;;  %141 = vlog2.f32 %v68_v0  ;;  %v78_v4 = vsub.f32 1.0, %v68_v0  ;;  %v79_v5 = vsub.f32 1.0, %v69_v1  ;;  %v105_v8 = vadd.f32 %v69_v1, %v68_v0  ;;  %s118_s6 = sshll.u32 %s225_s1, 4  ;;  %s119_s6 = int_to_ptr.vmem [resolvable:$true] %s118_s6 }
  0x28   :  { %v98_v6 = vmul.f32 %v70_v2, %v68_v0  ;;  %143 = vlog2.f32 %v69_v1  ;;  %v99_v7 = vmul.f32 %v71_v3, %v69_v1  ;;  %v110_v9 = vadd.f32 %v71_v3, %v70_v2  ;;  %s193_s7 = scalar_lea.vmem %s119_s6, 512  ;;  %p198_p3 = scmp.lt.s32.totalorder %s119_s6, %s119_s6 }
  0x29   :  { %145 = vlog2.f32 %v78_v4  ;;  %107 = vst [vmem:[#allocation7 + $0x10] sm:$0xff] %v105_v8  ;;  %p194_p2 = scmp.ne.s32.totalorder %s119_s6, %s193_s7  ;;  %p199_p4 = scmp.lt.s32.totalorder %s193_s7, %s193_s7 }
  0x2a   :  { %147 = vlog2.f32 %v79_v5  ;;  %v100_v10 = vadd.f32 %v99_v7, %v98_v6  ;;  %112 = vst [vmem:[#allocation7 + $0x18] sm:$0xff] %v110_v9 }
  0x2b   :  { %p200_p5 = por %p199_p4, %p198_p3 }
  0x2c   :  { %102 = vst [vmem:[#allocation7 + $0x8] sm:$0xff] %v100_v10 }
  0x2d   :  { %p201_p6 = pnand %p200_p5, %p194_p2 }
  0x31   :  { %v142_v11 = vpop.eup %141 }
  0x32   :  { %v144_v12 = vpop.eup %143  ;;  %v73_v13 = vmul.f32 0.6931472, %v142_v11 }
  0x33   :  { %v146_v14 = vpop.eup %145  ;;  %v75_v15 = vmul.f32 0.6931472, %v144_v12 }
  0x34   :  { %v148_v16 = vpop.eup %147  ;;  %v76_v17 = vmax.f32 %v73_v13, -100.0  ;;  %v81_v18 = vmul.f32 0.6931472, %v146_v14 }
  0x35   :  { %v77_v19 = vmax.f32 %v75_v15, -100.0  ;;  %v83_v20 = vmul.f32 0.6931472, %v148_v16 }
  0x36   :  { %v84_v21 = vmax.f32 %v81_v18, -100.0 }
  0x37   :  { %v85_v22 = vmax.f32 %v83_v20, -100.0 }
  0x38   :  { %v86_v23 = vsub.f32 %v76_v17, %v84_v21 }
  0x39   :  { %v87_v24 = vsub.f32 %v77_v19, %v85_v22 }
  0x3a   :  { %v88_v25 = vmul.f32 %v86_v23, %v70_v2 }
  0x3b   :  { %v89_v26 = vmul.f32 %v87_v24, %v71_v3 }
  0x3c   :  { %v90_v27 = vadd.f32 %v88_v25, %v84_v21 }
  0x3d   :  { %v91_v28 = vadd.f32 %v89_v26, %v85_v22 }
  0x3f   :  { %v93_v29 = vadd.f32 %v91_v28, %v90_v27 }
  0x41   :  { %95 = vst [vmem:[#allocation7] sm:$0xff] %v93_v29 }
  0x42   :  { %204 = shalt.err (!%p201_p6)
}
  0x43   :  { %s205_s10 = scalar_lea.hbm %s288_s2, 512 }
  0x44   :  { %p206_p7 = scmp.ne.s32.totalorder %s288_s2, %s205_s10  ;;  %p209_p8 = scmp.lt.u32.totalorder %s205_s10, %s288_s2 }
  0x46   :  { %p211_p9 = pnand %p209_p8, %p206_p7 }
  0x48   :  { %214 = shalt.err (!%p211_p9)
}
  0x49   :  { %124 = dma.vmem_to_hbm [thread:$0]  %s119_s6, 512, %s288_s2, [#allocation4], %s222_s19, %s222_s19, %s223_s20  }
  0x4a   :  { %219 = dma.done.wait [#allocation4], 512  }
  0x4b   :  { %220 = vsyncadd [#allocation4], 4294966784 }
  0x4c   :  { %128 = vsyncpa [#allocation3], 1 }
  0x4d   :  { %129 = vsyncpa [#allocation6], 1 }
  0x4e   :  { %130 = vsyncpa [#allocation4], 1 }

</bundles_post_ra>
